<compile_context>
chip_gen: v7x
topology: tpu7x:2x2x1
jax: 0.10.0
libtpu: 0.0.40
codegen_flags: <defaults>
</compile_context>

<pallas_src>
import functools

import jax
import jax.numpy as jnp
from jax.experimental import pallas as pl
from jax.experimental.pallas import tpu as pltpu

LANE = 128
SUBLANE = 8


def _round_up(x, m):
    return (x + m - 1) // m * m


def _choose_tiles(n, tile_n_max=4096):
    """Lane-aligned N tile; capped at ~N/2 so there are >=2 grid steps when N allows, letting the
    'parallel' grid axis shard across both TensorCores on v7x (v5e/v6e have a single TC)."""
    half = _round_up(max(1, -(-n // 2)), LANE)
    tile_n = max(LANE, min(tile_n_max, half))
    npad = _round_up(n, tile_n)
    return tile_n, npad


def _conv_stats_kernel(wT_ref, gT_ref, convT_ref, sum_ref, ssq_ref):
    # One MXU matmul per N tile: [Coutp, KCp] (bf16) @ [KCp, tile_n] (bf16) -> f32 [Coutp, tile_n].
    x = jnp.dot(wT_ref[...], gT_ref[...], preferred_element_type=jnp.float32)
    convT_ref[...] = x
    # Per-tile BN partial statistics, written once (no sublane broadcast).  Padded N columns of gT
    # are exactly zero, so they contribute 0 to both sums.
    sum_ref[...] = jnp.sum(x, axis=1, keepdims=True)[None, :, :]
    ssq_ref[...] = jnp.sum(x * x, axis=1, keepdims=True)[None, :, :]


def _bn_relu_kernel(convT_ref, scale_ref, shift_ref, o_ref):
    # BN folded into a single FMA (scale = rstd*gamma, shift = beta - mean*scale) + ReLU, f32.
    y = convT_ref[...] * scale_ref[...] + shift_ref[...]
    o_ref[...] = jnp.maximum(y, 0.0).astype(o_ref.dtype)


@functools.partial(jax.jit, static_argnames=("n_valid", "tile_n", "eps"))
def basic_convolution_block(gathered_t, weight, gamma, beta, *, n_valid, tile_n, eps=1e-5):
    """gathered_t: [KCp, Npad] bf16 (neighbor-gathered, transposed, zero-padded),
    weight: [K*Cin, Cout] f32, gamma/beta: [Cout] f32.
    Returns [n_valid, Cout] f32 = ReLU(BN_train(sparse_conv(x)))."""
    KCp, Npad = gathered_t.shape
    KC, Cout = weight.shape
    assert Npad % tile_n == 0 and tile_n % LANE == 0 and KCp % LANE == 0 and KC <= KCp
    Coutp = _round_up(Cout, SUBLANE)          # only sublane padding on the narrow output axis
    num_tiles = Npad // tile_n

    # Tiny resident weight tile (fetched once, constant index_map).
    wT = jnp.zeros((Coutp, KCp), jnp.bfloat16).at[:Cout, :KC].set(weight.T.astype(jnp.bfloat16))

    cparams = pltpu.CompilerParams(
        dimension_semantics=("parallel",),     # N-tile axis shards across TCs on v7x
        vmem_limit_bytes=32 * 1024 * 1024,     # safe on 64 MiB (v7x) and 128 MiB (v5e/v6e)
    )

    # Pass 1: conv matmul per N tile (narrow f32 intermediate) + per-tile BN partial statistics.
    convT, psum, pssq = pl.pallas_call(
        _conv_stats_kernel,
        out_shape=(
            jax.ShapeDtypeStruct((Coutp, Npad), jnp.float32),
            jax.ShapeDtypeStruct((num_tiles, Coutp, 1), jnp.float32),
            jax.ShapeDtypeStruct((num_tiles, Coutp, 1), jnp.float32),
        ),
        grid_spec=pltpu.PrefetchScalarGridSpec(
            num_scalar_prefetch=0,
            grid=(num_tiles,),
            in_specs=[
                pl.BlockSpec((Coutp, KCp), lambda i: (0, 0)),     # weight resident
                pl.BlockSpec((KCp, tile_n), lambda i: (0, i)),
            ],
            out_specs=[
                pl.BlockSpec((Coutp, tile_n), lambda i: (0, i)),
                pl.BlockSpec((1, Coutp, 1), lambda i: (i, 0, 0)),
                pl.BlockSpec((1, Coutp, 1), lambda i: (i, 0, 0)),
            ],
        ),
        compiler_params=cparams,
    )(wT, gathered_t)

    # Tiny global reduction -> training-mode BN statistics over the *actual* n_valid points
    # (padded N columns contribute exactly 0).  Fold BN into one scale/shift pair.
    n = jnp.float32(n_valid)
    sum_c = jnp.sum(psum[:, :, 0], axis=0)                       # [Coutp]
    ssq_c = jnp.sum(pssq[:, :, 0], axis=0)                       # [Coutp]
    mean = sum_c / n
    # TODO(synk): E[x^2]-E[x]^2 cancels when |mean| >> std; switch to a shifted-sum reduction if
    # channel means can be large relative to their spread.
    var = jnp.maximum(ssq_c / n - mean * mean, 0.0)              # biased (training-mode) variance
    rstd = jax.lax.rsqrt(var + eps)
    gm = jnp.zeros((Coutp,), jnp.float32).at[:Cout].set(gamma.reshape(-1))
    bt = jnp.zeros((Coutp,), jnp.float32).at[:Cout].set(beta.reshape(-1))
    scale = (rstd * gm).reshape(Coutp, 1)
    shift = (bt - mean * rstd * gm).reshape(Coutp, 1)

    # Pass 2: apply folded BN + ReLU, fully parallel over N tiles, lane-dense output along N.
    outT = pl.pallas_call(
        _bn_relu_kernel,
        out_shape=jax.ShapeDtypeStruct((Coutp, Npad), jnp.float32),
        grid_spec=pltpu.PrefetchScalarGridSpec(
            num_scalar_prefetch=0,
            grid=(num_tiles,),
            in_specs=[
                pl.BlockSpec((Coutp, tile_n), lambda i: (0, i)),
                pl.BlockSpec((Coutp, 1), lambda i: (0, 0)),
                pl.BlockSpec((Coutp, 1), lambda i: (0, 0)),
            ],
            out_specs=pl.BlockSpec((Coutp, tile_n), lambda i: (0, i)),
        ),
        compiler_params=cparams,
    )(convT, scale, shift)

    # Small final transpose/slice back to the torchsparse [N, Cout] feature layout.
    return outT[:Cout, :n_valid].T


def build_gathered_T(coords, feats, *, npad, kcp, ks=3, dilation=1):
    """Plain-JAX glue: submanifold sparse-conv kernel map (stride=1).  For each of K=ks^3 offsets
    and each output point i, find input j with coords[j] == coords[i] + offset (same batch) and
    gather its features (zeroed if no neighbor).  Emits the operand already transposed, bf16 and
    padded to the kernel's tiled shape [kcp, npad] (offset-major rows, matching
    weight.reshape(K*Cin, Cout)), so the wrapper does no extra full-tensor padding pass.
    TODO(synk): replace the O(N^2) coordinate match + materialized gather with a hash join and an
    in-kernel scalar-prefetched neighbor-index gather for production point-cloud sizes."""
    N, Cin = feats.shape
    K = ks ** 3
    KC = K * Cin
    r = ks // 2
    # Sentinel coordinates for padded rows can never match real voxels; their features are zero,
    # so even sentinel self-matches at offset 0 gather zeros.
    coords_p = jnp.full((npad, coords.shape[1]), -(10 ** 6), coords.dtype).at[:N].set(coords)
    feats_p = jnp.zeros((npad, Cin), jnp.bfloat16).at[:N].set(feats.astype(jnp.bfloat16))
    rows = []
    for dx in range(-r, r + 1):
        for dy in range(-r, r + 1):
            for dz in range(-r, r + 1):
                off = jnp.array([0, dx * dilation, dy * dilation, dz * dilation],
                                dtype=coords.dtype)
                target = coords_p + off                                              # [npad, 4]
                match = jnp.all(coords_p[None, :, :] == target[:, None, :], axis=-1)  # [npad, npad]
                has = jnp.any(match, axis=-1)
                idx = jnp.argmax(match, axis=-1)
                gathered = feats_p[idx] * has[:, None].astype(jnp.bfloat16)          # [npad, Cin]
                rows.append(gathered.T)                                              # [Cin, npad]
    gT = jnp.concatenate(rows, axis=0)                                               # [KC, npad]
    if kcp > KC:
        gT = jnp.concatenate([gT, jnp.zeros((kcp - KC, npad), jnp.bfloat16)], axis=0)
    return gT


if __name__ == "__main__":
    key = jax.random.PRNGKey(0)
    k_perm, k_feat, k_w = jax.random.split(key, 3)

    # Small synthetic sparse voxel cloud: 2 batches, unique coords from a 4x4x4 lattice.
    B, side = 2, 4
    lattice = jnp.array(
        [(b, x, y, z) for b in range(B) for x in range(side)
         for y in range(side) for z in range(side)],
        dtype=jnp.int32,
    )                                                        # [128, 4]
    perm = jax.random.permutation(k_perm, lattice.shape[0])
    N = 64
    coords = lattice[perm[:N]]                               # [64, 4] unique sparse coords

    Cin, Cout, ks = 4, 8, 3
    K = ks ** 3
    KC = K * Cin
    feats = jax.random.normal(k_feat, (N, Cin), dtype=jnp.float32)

    # spnn.Conv3d has no bias; BN affine params at identity init.
    weight = jax.random.normal(k_w, (K, Cin, Cout), dtype=jnp.float32) * (1.0 / (K * Cin) ** 0.5)
    gamma = jnp.ones((Cout,), dtype=jnp.float32)
    beta = jnp.zeros((Cout,), dtype=jnp.float32)

    tile_n, npad = _choose_tiles(N)
    KCp = _round_up(KC, LANE)
    gT = build_gathered_T(coords, feats, npad=npad, kcp=KCp, ks=ks, dilation=1)  # [KCp, Npad] bf16
    w2d = weight.reshape(KC, Cout)                                               # [K*Cin, Cout]

    out = basic_convolution_block(gT, w2d, gamma, beta, n_valid=N, tile_n=tile_n)
    out = jax.block_until_ready(out)

    # Plain-JAX reference with the same bf16 operand quantization the kernel uses (f32 accumulation
    # and f32 BN/ReLU), so only accumulation-order / tiny FP differences remain.
    g_ref = gT[:KC, :N].T.astype(jnp.float32)                 # [N, K*Cin]
    w_ref = w2d.astype(jnp.bfloat16).astype(jnp.float32)
    conv_ref = g_ref @ w_ref
    mean = jnp.mean(conv_ref, axis=0, keepdims=True)
    var = jnp.mean((conv_ref - mean) ** 2, axis=0, keepdims=True)
    ref = jnp.maximum((conv_ref - mean) * jax.lax.rsqrt(var + 1e-5) * gamma + beta, 0.0)
    assert out.shape == (N, Cout)
    assert jnp.allclose(out, ref, rtol=2e-3, atol=2e-3), "mismatch vs reference"

    print("KERNEL_OK")
</pallas_src>

<mosaic_0001>
module attributes {stable_mosaic.version = 11 : i64} {
  func.func @_conv_stats_kernel(%arg0: i32, %arg1: memref<8x128xbf16, #tpu.memory_space<vmem>>, %arg2: memref<128x128xbf16, #tpu.memory_space<vmem>>, %arg3: memref<8x128xf32, #tpu.memory_space<vmem>>, %arg4: memref<1x8x1xf32, #tpu.memory_space<vmem>>, %arg5: memref<1x8x1xf32, #tpu.memory_space<vmem>>) attributes {dimension_semantics = [#tpu.dimension_semantics<parallel>], iteration_bounds = array<i64: 1>, scalar_prefetch = 0 : i64, scratch_operands = 0 : i64, tpu.core_type = #tpu.core_type<tc>, window_params = [{pipeline_mode = #tpu.pipeline_mode<synchronous>, transform_indices = @transform_0, window_bounds = array<i64: 8, 128>}, {transform_indices = @transform_1, window_bounds = array<i64: 128, 128>}, {transform_indices = @transform_2, window_bounds = array<i64: 8, 128>}, {transform_indices = @transform_3, window_bounds = array<i64: 1, 8, 1>}, {transform_indices = @transform_4, window_bounds = array<i64: 1, 8, 1>}]} {
    %c0 = arith.constant 0 : index
    %c0_0 = arith.constant 0 : index
    %0 = vector.load %arg1[%c0, %c0_0] : memref<8x128xbf16, #tpu.memory_space<vmem>>, vector<8x128xbf16>
    %c0_1 = arith.constant 0 : index
    %c0_2 = arith.constant 0 : index
    %1 = vector.load %arg2[%c0_1, %c0_2] : memref<128x128xbf16, #tpu.memory_space<vmem>>, vector<128x128xbf16>
    %cst = arith.constant dense<0.000000e+00> : vector<8x128xf32>
    %2 = tpu.matmul %0, %1, %cst {dimension_numbers = #tpu.dot_dimension_numbers<[1], [0], [0], [1], [0, 0, 1, 1], [], []>} : vector<8x128xbf16>, vector<128x128xbf16>, vector<8x128xf32> -> vector<8x128xf32>
    %c0_3 = arith.constant 0 : index
    %c0_4 = arith.constant 0 : index
    %3 = vector.load %arg3[%c0_3, %c0_4] : memref<8x128xf32, #tpu.memory_space<vmem>>, vector<8x128xf32>
    tpu.vector_store %arg3[%c0_3, %c0_4], %2 {strides = array<i32>} : memref<8x128xf32, #tpu.memory_space<vmem>>, vector<8x128xf32>,
    %cst_5 = arith.constant dense<0.000000e+00> : vector<8xf32>
    %4 = vector.multi_reduction <add>, %2, %cst_5 [1] : vector<8x128xf32> to vector<8xf32>
    %5 = vector.shape_cast %4 : vector<8xf32> to vector<8x1xf32>
    %6 = vector.shape_cast %5 : vector<8x1xf32> to vector<1x8x1xf32>
    %c0_6 = arith.constant 0 : index
    %c0_7 = arith.constant 0 : index
    %c0_8 = arith.constant 0 : index
    %7 = vector.load %arg4[%c0_6, %c0_7, %c0_8] : memref<1x8x1xf32, #tpu.memory_space<vmem>>, vector<1x8x1xf32>
    tpu.vector_store %arg4[%c0_6, %c0_7, %c0_8], %6 {strides = array<i32>} : memref<1x8x1xf32, #tpu.memory_space<vmem>>, vector<1x8x1xf32>,
    %8 = arith.mulf %2, %2 : vector<8x128xf32>
    %cst_9 = arith.constant dense<0.000000e+00> : vector<8xf32>
    %9 = vector.multi_reduction <add>, %8, %cst_9 [1] : vector<8x128xf32> to vector<8xf32>
    %10 = vector.shape_cast %9 : vector<8xf32> to vector<8x1xf32>
    %11 = vector.shape_cast %10 : vector<8x1xf32> to vector<1x8x1xf32>
    %c0_10 = arith.constant 0 : index
    %c0_11 = arith.constant 0 : index
    %c0_12 = arith.constant 0 : index
    %12 = vector.load %arg5[%c0_10, %c0_11, %c0_12] : memref<1x8x1xf32, #tpu.memory_space<vmem>>, vector<1x8x1xf32>
    tpu.vector_store %arg5[%c0_10, %c0_11, %c0_12], %11 {strides = array<i32>} : memref<1x8x1xf32, #tpu.memory_space<vmem>>, vector<1x8x1xf32>,
    return
  }
  func.func @transform_0(%arg0: i32) -> (i32, i32) {
    %c0_i32 = arith.constant 0 : i32
    %c0_i32_0 = arith.constant 0 : i32
    %c0_i32_1 = arith.constant 0 : i32
    return %c0_i32, %c0_i32_0 : i32, i32
  }
  func.func @transform_1(%arg0: i32) -> (i32, i32) {
    %c0_i32 = arith.constant 0 : i32
    %c0_i32_0 = arith.constant 0 : i32
    return %c0_i32, %arg0 : i32, i32
  }
  func.func @transform_2(%arg0: i32) -> (i32, i32) {
    %c0_i32 = arith.constant 0 : i32
    %c0_i32_0 = arith.constant 0 : i32
    return %c0_i32, %arg0 : i32, i32
  }
  func.func @transform_3(%arg0: i32) -> (i32, i32, i32) {
    %c0_i32 = arith.constant 0 : i32
    %c0_i32_0 = arith.constant 0 : i32
    %c0_i32_1 = arith.constant 0 : i32
    return %arg0, %c0_i32, %c0_i32_0 : i32, i32, i32
  }
  func.func @transform_4(%arg0: i32) -> (i32, i32, i32) {
    %c0_i32 = arith.constant 0 : i32
    %c0_i32_0 = arith.constant 0 : i32
    %c0_i32_1 = arith.constant 0 : i32
    return %arg0, %c0_i32, %c0_i32_0 : i32, i32, i32
  }
}

module attributes {stable_mosaic.version = 11 : i64} {
  func.func @_bn_relu_kernel(%arg0: i32, %arg1: memref<8x128xf32, #tpu.memory_space<vmem>>, %arg2: memref<8x1xf32, #tpu.memory_space<vmem>>, %arg3: memref<8x1xf32, #tpu.memory_space<vmem>>, %arg4: memref<8x128xf32, #tpu.memory_space<vmem>>) attributes {dimension_semantics = [#tpu.dimension_semantics<parallel>], iteration_bounds = array<i64: 1>, scalar_prefetch = 0 : i64, scratch_operands = 0 : i64, tpu.core_type = #tpu.core_type<tc>, window_params = [{transform_indices = @transform_0, window_bounds = array<i64: 8, 128>}, {pipeline_mode = #tpu.pipeline_mode<synchronous>, transform_indices = @transform_1, window_bounds = array<i64: 8, 1>}, {pipeline_mode = #tpu.pipeline_mode<synchronous>, transform_indices = @transform_2, window_bounds = array<i64: 8, 1>}, {transform_indices = @transform_3, window_bounds = array<i64: 8, 128>}]} {
    %c0 = arith.constant 0 : index
    %c0_0 = arith.constant 0 : index
    %0 = vector.load %arg1[%c0, %c0_0] : memref<8x128xf32, #tpu.memory_space<vmem>>, vector<8x128xf32>
    %c0_1 = arith.constant 0 : index
    %c0_2 = arith.constant 0 : index
    %1 = vector.load %arg2[%c0_1, %c0_2] : memref<8x1xf32, #tpu.memory_space<vmem>>, vector<8x1xf32>
    %2 = vector.broadcast %1 : vector<8x1xf32> to vector<8x128xf32>
    %3 = arith.mulf %0, %2 : vector<8x128xf32>
    %c0_3 = arith.constant 0 : index
    %c0_4 = arith.constant 0 : index
    %4 = vector.load %arg3[%c0_3, %c0_4] : memref<8x1xf32, #tpu.memory_space<vmem>>, vector<8x1xf32>
    %5 = vector.broadcast %4 : vector<8x1xf32> to vector<8x128xf32>
    %6 = arith.addf %3, %5 : vector<8x128xf32>
    %cst = arith.constant 0.000000e+00 : f32
    %7 = vector.broadcast %cst : f32 to vector<8x128xf32>
    %8 = arith.maximumf %6, %7 : vector<8x128xf32>
    %c0_5 = arith.constant 0 : index
    %c0_6 = arith.constant 0 : index
    %9 = vector.load %arg4[%c0_5, %c0_6] : memref<8x128xf32, #tpu.memory_space<vmem>>, vector<8x128xf32>
    tpu.vector_store %arg4[%c0_5, %c0_6], %8 {strides = array<i32>} : memref<8x128xf32, #tpu.memory_space<vmem>>, vector<8x128xf32>,
    return
  }
  func.func @transform_0(%arg0: i32) -> (i32, i32) {
    %c0_i32 = arith.constant 0 : i32
    %c0_i32_0 = arith.constant 0 : i32
    return %c0_i32, %arg0 : i32, i32
  }
  func.func @transform_1(%arg0: i32) -> (i32, i32) {
    %c0_i32 = arith.constant 0 : i32
    %c0_i32_0 = arith.constant 0 : i32
    %c0_i32_1 = arith.constant 0 : i32
    return %c0_i32, %c0_i32_0 : i32, i32
  }
  func.func @transform_2(%arg0: i32) -> (i32, i32) {
    %c0_i32 = arith.constant 0 : i32
    %c0_i32_0 = arith.constant 0 : i32
    %c0_i32_1 = arith.constant 0 : i32
    return %c0_i32, %c0_i32_0 : i32, i32
  }
  func.func @transform_3(%arg0: i32) -> (i32, i32) {
    %c0_i32 = arith.constant 0 : i32
    %c0_i32_0 = arith.constant 0 : i32
    return %c0_i32, %arg0 : i32, i32
  }
}

</mosaic_0001>

<bundles_post_ra>
// kernel: basic_convolution_block.3
= control target key start
LH: loop header
LB: loop body
LE: loop exit
PB: predicated region body
PF: predicated region fallthrough
CT: control target
= control target key end

     0   :  { %v37_v0 = vmov 0   ;;  %s70_s1 = inlined_call_operand.vmem [shape: f32[8,1], index: 1, kind: input, shape index: {}]   ;;  %s71_s2 = inlined_call_operand.vmem [shape: f32[8,1], index: 2, kind: input, shape index: {}]   ;;  %s72_s0 = inlined_call_operand.vmem [shape: f32[8,128], index: 0, kind: input, shape index: {}]   ;;  %s73_s3 = inlined_call_operand.vmem [shape: f32[8,128], index: 3, kind: output, shape index: {}]  }
   0x1   :  { %36 = vset.pattern.permute.xlu0 %v37_v0  ;;  %v15_v1 = vld [vmem:[%s70_s1] sm:$0xff] }
   0x2   :  { %18 = vperm.xlu0 %36, %v15_v1   ;;  %v22_v2 = vld [vmem:[%s71_s2] sm:$0xff] }
   0x3   :  { %v14_v4 = vld [vmem:[%s72_s0] sm:$0xff] }
   0x6   :  { %25 = vperm.xlu0 %36, %v22_v2  }
  0x81   :  { %v19_v3 = vpop.permute.xlu0 %18 }
  0x82   :  { %v21_v5 = vmul.f32 %v19_v3, %v14_v4 }
  0x85   :  { %v26_v6 = vpop.permute.xlu0 %25 }
  0x86   :  { %v28_v7 = vadd.f32 %v26_v6, %v21_v5 }
  0x88   :  { %v29_v8 = vmax.f32 %v28_v7, 0.0 }
  0x8a   :  { %30 = vst [vmem:[%s73_s3] sm:$0xff] %v29_v8 }

// kernel: basic_convolution_block.2
= control target key start
LH: loop header
LB: loop body
LE: loop exit
PB: predicated region body
PF: predicated region fallthrough
CT: control target
= control target key end

     0   :  { %10 = vsyncpa [#allocation3], 0  ;;  %s230_s15 = smov [#allocation2]   ;;  %s284_s0 = inlined_call_operand.vmem [shape: bf16[8,128], index: 0, kind: input, shape index: {}]   ;;  %s285_s1 = inlined_call_operand.hbm [shape: bf16[128,128], index: 1, kind: input, shape index: {}]   ;;  %s286_s2 = inlined_call_operand.vmem [shape: f32[8,128], index: 2, kind: output, shape index: {0}]   ;;  %s287_s3 = inlined_call_operand.vmem [shape: f32[1,8,1], index: 3, kind: output, shape index: {1}]   ;;  %s288_s4 = inlined_call_operand.vmem [shape: f32[1,8,1], index: 4, kind: output, shape index: {2}]  }
   0x1   :  { %s18_s16 = sshll.u32 %s230_s15, 4  ;;  %s206_s19 = scalar_lea.hbm %s285_s1, 1024  ;;  %s19_s16 = int_to_ptr.vmem [resolvable:$true] %s18_s16 }
   0x2   :  { %p207_p0 = scmp.ne.s32.totalorder %s285_s1, %s206_s19  ;;  %p210_p1 = scmp.lt.u32.totalorder %s206_s19, %s285_s1 }
   0x4   :  { %p212_p2 = pnand %p210_p1, %p207_p0 }
   0x6   :  { %215 = shalt.err (!%p212_p2)
}
   0x7   :  { %s216_s24 = scalar_lea.vmem %s19_s16, 1024  ;;  %p221_p4 = scmp.lt.s32.totalorder %s19_s16, %s19_s16 }
   0x8   :  { %p217_p3 = scmp.ne.s32.totalorder %s19_s16, %s216_s24  ;;  %p222_p5 = scmp.lt.s32.totalorder %s216_s24, %s216_s24 }
   0xa   :  { %p223_p6 = por %p222_p5, %p221_p4 }
   0xc   :  { %p224_p7 = pnand %p223_p6, %p217_p3 }
   0xe   :  { %227 = shalt.err (!%p224_p7)
}
   0xf   :  { %s231_s25 = smov 64   ;;  %s232_s26 = smov 4  }
  0x10   :  { %24 = dma.hbm_to_vmem [thread:$0]  %s285_s1, 1024, %s19_s16, [#allocation3], %s231_s25, %s231_s25, %s232_s26  }
  0x11   :  { %228 = dma.done.wait [#allocation3], 1024  }
  0x12   :  { %229 = vsyncadd [#allocation3], 4294966272  ;;  %v233_v0 = vmov 0.0   ;;  %vm234_vm0 = vmmov 0   ;;  %v198_v1 = vld [vmem:[#allocation2] sm:$0xff]   ;;  %v199_v2 = vld [vmem:[#allocation2 + $0x8] sm:$0xff]  }
  0x13   :  { %173 = vmatprep.subr.bf16.mxu0 %v233_v0  ;;  %189 = vmatprep.mubr.msk.bf16.mxu0 %vm234_vm0, %v233_v0  ;;  %v200_v3 = vld [vmem:[#allocation2 + $0x10] sm:$0xff]   ;;  %v201_v4 = vld [vmem:[#allocation2 + $0x18] sm:$0xff]   ;;  %v202_v5 = vld [vmem:[#allocation2 + $0x20] sm:$0xff]   ;;  %vm137_vm1 = vcmask 7168  }
  0x14   :  { %174 = vmatpush3.bf16.msra.mxu0 %v198_v1  ;;  %v203_v6 = vld [vmem:[#allocation2 + $0x28] sm:$0xff]   ;;  %v204_v7 = vld [vmem:[#allocation2 + $0x30] sm:$0xff]   ;;  %v205_v8 = vld [vmem:[#allocation2 + $0x38] sm:$0xff]  }
  0x15   :  { %175 = vmatprep.subr.bf16.mxu0 %v233_v0  ;;  %v29_v9 = vld [vmem:[%s284_s0] sm:$0xf] }
  0x18   :  { %176 = vmatpush3.bf16.msra.mxu0 %v199_v2 }
  0x19   :  { %177 = vmatprep.subr.bf16.mxu0 %v233_v0 }
  0x1c   :  { %178 = vmatpush3.bf16.msra.mxu0 %v200_v3 }
  0x1d   :  { %179 = vmatprep.subr.bf16.mxu0 %v233_v0 }
  0x20   :  { %180 = vmatpush3.bf16.msra.mxu0 %v201_v4 }
  0x21   :  { %181 = vmatprep.subr.bf16.mxu0 %v233_v0 }
  0x24   :  { %182 = vmatpush3.bf16.msra.mxu0 %v202_v5 }
  0x25   :  { %183 = vmatprep.subr.bf16.mxu0 %v233_v0 }
  0x28   :  { %184 = vmatpush3.bf16.msra.mxu0 %v203_v6 }
  0x29   :  { %185 = vmatprep.subr.bf16.mxu0 %v233_v0 }
  0x2c   :  { %186 = vmatpush3.bf16.msra.mxu0 %v204_v7 }
  0x2d   :  { %187 = vmatprep.subr.bf16.mxu0 %v233_v0 }
  0x30   :  { %188 = vmatpush3.bf16.msra.mxu0 %v205_v8 }
  0x33   :  { %190 = vmatmul.mubr.bf16.vlgmr.msra.gmra.mrb[0].mxu0 %v29_v9 }
 0x106   :  { %v128_v10 = vpop.f32.mrb[0].mxu0 }
 0x107   :  { %134 = vst [vmem:[%s286_s2] sm:$0xff] %v128_v10  ;;  %135 = vadd.xlane.f32.xlu0 %v128_v10  ;;  %v191_v11 = vpop.f32.mrb[1].mxu0  ;;  %v139_v14 = vmul.f32 %v128_v10, %v128_v10 }
 0x108   :  { %v131_v12 = vpop.f32.mrb[2].mxu0 }
 0x109   :  { %v192_v13 = vpop.f32.mrb[3].mxu0 }
 0x10b   :  { %140 = vadd.xlane.f32.xlu0 %v139_v14 }
 0x194   :  { %v136_v15 = vpop.xlane.xlu0 %135 }
 0x195   :  { %138 = vst.msk [vmem:[%s287_s3] sm:$0xff] %vm137_vm1, %v136_v15 }
 0x198   :  { %v141_v16 = vpop.xlane.xlu0 %140 }
 0x199   :  { %142 = vst.msk [vmem:[%s288_s4] sm:$0xff] %vm137_vm1, %v141_v16 }
 0x19a   :  { %155 = vsyncpa [#allocation3], 1 }

</bundles_post_ra>
